<compile_context>
chip_gen: v6e
topology: v6e:2x2x1
jax: 0.10.0
libtpu: 0.0.40
codegen_flags: <defaults>
</compile_context>

<pallas_src>
import jax
import jax.numpy as jnp
from jax.experimental import pallas as pl
from jax.experimental.pallas import tpu as pltpu


def _round_up(x, m):
    return ((x + m - 1) // m) * m


def _choose_block_rows(m_rows, target_rows=1024, min_parallel_rows=512):
    """Pick the per-grid-step row tile M_blk for the flattened (rows, 256) matrix.

    Independent of B/L divisibility; always a multiple of 8 (sublane aligned).
      * big problems  -> fixed target_rows tile (MXU-filling, VMEM-safe on all gens)
      * mid problems  -> split once only if each half keeps >= min_parallel_rows
                         (so v7x's two TensorCores both get fat work)
      * tiny problems -> one dense block (no pointless splitting)
    """
    m8 = _round_up(max(m_rows, 8), 8)
    if m8 > target_rows:
        return target_rows
    if m8 >= 2 * min_parallel_rows:
        return _round_up((m8 + 1) // 2, 8)
    return m8


def _pooler_kernel(x_ref, w_hi_ref, w_lo_ref, b_ref, out_ref):
    """One row tile of  relu(x @ W + b) @ W + b  on the MXU (bf16x3, f32 accum)."""
    w_hi = w_hi_ref[...]                                  # (H, C) bf16
    w_lo = w_lo_ref[...]                                  # (H, C) bf16
    b = b_ref[...]                                        # (1, C) f32

    def mm_f32(a_f32):
        # hi/lo split so the MXU runs native bf16 passes; dropping only the
        # lo*lo term keeps ~f32 accuracy. Accumulate in f32.
        a_hi = a_f32.astype(jnp.bfloat16)
        a_lo = (a_f32 - a_hi.astype(jnp.float32)).astype(jnp.bfloat16)
        acc = jnp.dot(a_hi, w_hi, preferred_element_type=jnp.float32)
        acc += jnp.dot(a_lo, w_hi, preferred_element_type=jnp.float32)
        acc += jnp.dot(a_hi, w_lo, preferred_element_type=jnp.float32)
        return acc

    # conv1 (k=1) == pointwise channel matmul; y1 stays in vregs/VMEM scratch.
    y1 = jnp.maximum(mm_f32(x_ref[...]) + b, 0.0)
    # conv1 again (no activation) — one dense, tile-aligned full-block store.
    out_ref[...] = mm_f32(y1) + b


def cnn_pooler_forward(hidden_states, conv1_w, conv1_b, *, target_rows=1024):
    """hidden_states: (B, L, H) f32; conv1_w: (256, H, 1); conv1_b: (256,).

    Returns (B, 256, L+4), matching the PyTorch module's NCL output layout.
    """
    B, L, H = hidden_states.shape
    C = conv1_w.shape[0]
    assert H == C == 256, "forward reuses conv1, so hidden_size must equal 256"

    # Pointwise conv == channel matmul: precompute W^T and its bf16 hi/lo split.
    w_f32 = jnp.transpose(conv1_w[:, :, 0]).astype(jnp.float32)        # (H, C)
    w_hi = w_f32.astype(jnp.bfloat16)
    w_lo = (w_f32 - w_hi.astype(jnp.float32)).astype(jnp.bfloat16)
    bias = conv1_b.reshape(1, C).astype(jnp.float32)                   # (1, C)

    # Flat row tiling over the (B*L, H) row matrix; pad the ragged tail.
    rows = B * L
    m_blk = _choose_block_rows(rows, target_rows=target_rows)
    rows_pad = _round_up(rows, m_blk)
    x_rows = hidden_states.astype(jnp.float32).reshape(rows, H)        # free reshape
    if rows_pad != rows:
        x_rows = jnp.pad(x_rows, ((0, rows_pad - rows), (0, 0)))
    grid = (rows_pad // m_blk,)

    cost = pl.CostEstimate(
        flops=2 * 2 * 3 * rows_pad * H * C,        # 2 matmuls x 3 bf16 MXU passes
        transcendentals=0,
        bytes_accessed=(rows_pad * H + rows_pad * C) * 4   # x in + y2 out (f32)
        + 2 * H * C * 2 + C * 4,                            # weights (bf16) + bias
    )

    y2 = pl.pallas_call(
        _pooler_kernel,
        out_shape=jax.ShapeDtypeStruct((rows_pad, C), jnp.float32),
        grid=grid,
        in_specs=[
            pl.BlockSpec((m_blk, H), lambda i: (i, 0)),    # row tile of x
            pl.BlockSpec((H, C), lambda i: (0, 0)),        # resident weights (hi)
            pl.BlockSpec((H, C), lambda i: (0, 0)),        # resident weights (lo)
            pl.BlockSpec((1, C), lambda i: (0, 0)),        # resident bias
        ],
        out_specs=pl.BlockSpec((m_blk, C), lambda i: (i, 0)),
        compiler_params=pltpu.CompilerParams(
            dimension_semantics=("parallel",)),
        cost_estimate=cost,
    )(x_rows, w_hi, w_lo, bias)

    if rows_pad != rows:
        y2 = y2[:rows]

    # --- batch-invariant pad columns, computed once (tiny XLA op) ------------
    #   out length index 0 / L+3 : bias                  (zero-padded conv input)
    #   out length index 1 / L+2 : relu(bias) @ W + bias (y1's pad columns)
    edge = jnp.dot(jnp.maximum(bias, 0.0), w_f32,
                   precision=jax.lax.Precision.HIGHEST) + bias          # (1, C)

    # Assemble PyTorch NCL layout: (B, 256, L+4).
    # TODO(synk): for lane-dense L (>= ~124) fuse this transpose + pad stitch
    # into the kernel epilogue to save one extra HBM pass over the output.
    y2_t = jnp.transpose(y2.reshape(B, L, C), (0, 2, 1))                # (B, C, L)
    b_col = jnp.broadcast_to(bias.reshape(1, C, 1), (B, C, 1))
    e_col = jnp.broadcast_to(edge.reshape(1, C, 1), (B, C, 1))
    return jnp.concatenate([b_col, e_col, y2_t, e_col, b_col], axis=2)


def ref_forward(hidden_states, conv1_w, conv1_b):
    """Pure-JAX reference mirroring the PyTorch forward exactly (f32, HIGHEST)."""
    x = jnp.transpose(hidden_states, (0, 2, 1))                         # (B, H, L)
    w = conv1_w[:, :, 0]                                                # (256, H)
    hp = jax.lax.Precision.HIGHEST
    xp = jnp.pad(x, ((0, 0), (0, 0), (1, 1)))
    y1 = jnp.einsum("oi,bil->bol", w, xp, precision=hp) + conv1_b[None, :, None]
    y1 = jnp.maximum(y1, 0.0)
    y1p = jnp.pad(y1, ((0, 0), (0, 0), (1, 1)))
    y2 = jnp.einsum("oi,bil->bol", w, y1p, precision=hp) + conv1_b[None, :, None]
    return y2


if __name__ == "__main__":
    B, L, HIDDEN = 2, 8, 256   # hidden_size must be 256 (forward reuses conv1)

    key = jax.random.PRNGKey(0)
    k_x, k_w1, k_b1, k_w2, k_b2 = jax.random.split(key, 5)

    hidden_states = jax.random.normal(k_x, (B, L, HIDDEN), dtype=jnp.float32)

    # conv1: Conv1d(hidden_size -> 256, kernel_size=1, padding=1)
    conv1_w = 0.02 * jax.random.normal(k_w1, (256, HIDDEN, 1), dtype=jnp.float32)
    conv1_b = 0.02 * jax.random.normal(k_b1, (256,), dtype=jnp.float32)

    # conv2: Conv1d(256 -> 1, kernel_size=2, padding=1) — declared in __init__
    # but never used in forward (dead code); kept only for module fidelity.
    conv2_w = 0.02 * jax.random.normal(k_w2, (1, 256, 2), dtype=jnp.float32)
    conv2_b = 0.02 * jax.random.normal(k_b2, (1,), dtype=jnp.float32)

    out = cnn_pooler_forward(hidden_states, conv1_w, conv1_b)
    out = jax.block_until_ready(out)

    ref = ref_forward(hidden_states, conv1_w, conv1_b)
    assert out.shape == (B, 256, L + 4), out.shape
    assert jnp.allclose(out, ref, atol=1e-4, rtol=1e-4), "mismatch vs reference"

    print("KERNEL_OK")
</pallas_src>

<mosaic_0001>
module attributes {stable_mosaic.version = 11 : i64} {
  func.func @_pooler_kernel(%arg0: i32, %arg1: memref<16x256xf32, #tpu.memory_space<vmem>>, %arg2: memref<256x256xbf16, #tpu.memory_space<vmem>>, %arg3: memref<256x256xbf16, #tpu.memory_space<vmem>>, %arg4: memref<1x256xf32, #tpu.memory_space<vmem>>, %arg5: memref<16x256xf32, #tpu.memory_space<vmem>>) attributes {dimension_semantics = [#tpu.dimension_semantics<parallel>], iteration_bounds = array<i64: 1>, scalar_prefetch = 0 : i64, scratch_operands = 0 : i64, tpu.core_type = #tpu.core_type<tc>, window_params = [{transform_indices = @transform_0, window_bounds = array<i64: 16, 256>}, {pipeline_mode = #tpu.pipeline_mode<synchronous>, transform_indices = @transform_1, window_bounds = array<i64: 256, 256>}, {pipeline_mode = #tpu.pipeline_mode<synchronous>, transform_indices = @transform_2, window_bounds = array<i64: 256, 256>}, {pipeline_mode = #tpu.pipeline_mode<synchronous>, transform_indices = @transform_3, window_bounds = array<i64: 1, 256>}, {transform_indices = @transform_4, window_bounds = array<i64: 16, 256>}]} {
    %c0 = arith.constant 0 : index
    %c0_0 = arith.constant 0 : index
    %0 = vector.load %arg2[%c0, %c0_0] : memref<256x256xbf16, #tpu.memory_space<vmem>>, vector<256x256xbf16>
    %c0_1 = arith.constant 0 : index
    %c0_2 = arith.constant 0 : index
    %1 = vector.load %arg3[%c0_1, %c0_2] : memref<256x256xbf16, #tpu.memory_space<vmem>>, vector<256x256xbf16>
    %c0_3 = arith.constant 0 : index
    %c0_4 = arith.constant 0 : index
    %2 = vector.load %arg4[%c0_3, %c0_4] : memref<1x256xf32, #tpu.memory_space<vmem>>, vector<1x256xf32>
    %c0_5 = arith.constant 0 : index
    %c0_6 = arith.constant 0 : index
    %3 = vector.load %arg1[%c0_5, %c0_6] : memref<16x256xf32, #tpu.memory_space<vmem>>, vector<16x256xf32>
    %4 = arith.truncf %3 : vector<16x256xf32> to vector<16x256xbf16>
    %5 = arith.extf %4 : vector<16x256xbf16> to vector<16x256xf32>
    %6 = arith.subf %3, %5 : vector<16x256xf32>
    %7 = arith.truncf %6 : vector<16x256xf32> to vector<16x256xbf16>
    %cst = arith.constant dense<0.000000e+00> : vector<16x256xf32>
    %8 = tpu.matmul %4, %0, %cst {dimension_numbers = #tpu.dot_dimension_numbers<[1], [0], [0], [1], [0, 0, 1, 1], [], []>} : vector<16x256xbf16>, vector<256x256xbf16>, vector<16x256xf32> -> vector<16x256xf32>
    %cst_7 = arith.constant dense<0.000000e+00> : vector<16x256xf32>
    %9 = tpu.matmul %7, %0, %cst_7 {dimension_numbers = #tpu.dot_dimension_numbers<[1], [0], [0], [1], [0, 0, 1, 1], [], []>} : vector<16x256xbf16>, vector<256x256xbf16>, vector<16x256xf32> -> vector<16x256xf32>
    %10 = arith.addf %8, %9 : vector<16x256xf32>
    %cst_8 = arith.constant dense<0.000000e+00> : vector<16x256xf32>
    %11 = tpu.matmul %4, %1, %cst_8 {dimension_numbers = #tpu.dot_dimension_numbers<[1], [0], [0], [1], [0, 0, 1, 1], [], []>} : vector<16x256xbf16>, vector<256x256xbf16>, vector<16x256xf32> -> vector<16x256xf32>
    %12 = arith.addf %10, %11 : vector<16x256xf32>
    %13 = vector.broadcast %2 : vector<1x256xf32> to vector<16x256xf32>
    %14 = arith.addf %12, %13 : vector<16x256xf32>
    %cst_9 = arith.constant 0.000000e+00 : f32
    %15 = vector.broadcast %cst_9 : f32 to vector<16x256xf32>
    %16 = arith.maximumf %14, %15 : vector<16x256xf32>
    %17 = arith.truncf %16 : vector<16x256xf32> to vector<16x256xbf16>
    %18 = arith.extf %17 : vector<16x256xbf16> to vector<16x256xf32>
    %19 = arith.subf %16, %18 : vector<16x256xf32>
    %20 = arith.truncf %19 : vector<16x256xf32> to vector<16x256xbf16>
    %cst_10 = arith.constant dense<0.000000e+00> : vector<16x256xf32>
    %21 = tpu.matmul %17, %0, %cst_10 {dimension_numbers = #tpu.dot_dimension_numbers<[1], [0], [0], [1], [0, 0, 1, 1], [], []>} : vector<16x256xbf16>, vector<256x256xbf16>, vector<16x256xf32> -> vector<16x256xf32>
    %cst_11 = arith.constant dense<0.000000e+00> : vector<16x256xf32>
    %22 = tpu.matmul %20, %0, %cst_11 {dimension_numbers = #tpu.dot_dimension_numbers<[1], [0], [0], [1], [0, 0, 1, 1], [], []>} : vector<16x256xbf16>, vector<256x256xbf16>, vector<16x256xf32> -> vector<16x256xf32>
    %23 = arith.addf %21, %22 : vector<16x256xf32>
    %cst_12 = arith.constant dense<0.000000e+00> : vector<16x256xf32>
    %24 = tpu.matmul %17, %1, %cst_12 {dimension_numbers = #tpu.dot_dimension_numbers<[1], [0], [0], [1], [0, 0, 1, 1], [], []>} : vector<16x256xbf16>, vector<256x256xbf16>, vector<16x256xf32> -> vector<16x256xf32>
    %25 = arith.addf %23, %24 : vector<16x256xf32>
    %26 = vector.broadcast %2 : vector<1x256xf32> to vector<16x256xf32>
    %27 = arith.addf %25, %26 : vector<16x256xf32>
    %c0_13 = arith.constant 0 : index
    %c0_14 = arith.constant 0 : index
    %28 = vector.load %arg5[%c0_13, %c0_14] : memref<16x256xf32, #tpu.memory_space<vmem>>, vector<16x256xf32>
    tpu.vector_store %arg5[%c0_13, %c0_14], %27 {strides = array<i32>} : memref<16x256xf32, #tpu.memory_space<vmem>>, vector<16x256xf32>,
    return
  }
  func.func @transform_0(%arg0: i32) -> (i32, i32) {
    %c0_i32 = arith.constant 0 : i32
    %c0_i32_0 = arith.constant 0 : i32
    return %arg0, %c0_i32 : i32, i32
  }
  func.func @transform_1(%arg0: i32) -> (i32, i32) {
    %c0_i32 = arith.constant 0 : i32
    %c0_i32_0 = arith.constant 0 : i32
    %c0_i32_1 = arith.constant 0 : i32
    return %c0_i32, %c0_i32_0 : i32, i32
  }
  func.func @transform_2(%arg0: i32) -> (i32, i32) {
    %c0_i32 = arith.constant 0 : i32
    %c0_i32_0 = arith.constant 0 : i32
    %c0_i32_1 = arith.constant 0 : i32
    return %c0_i32, %c0_i32_0 : i32, i32
  }
  func.func @transform_3(%arg0: i32) -> (i32, i32) {
    %c0_i32 = arith.constant 0 : i32
    %c0_i32_0 = arith.constant 0 : i32
    %c0_i32_1 = arith.constant 0 : i32
    return %c0_i32, %c0_i32_0 : i32, i32
  }
  func.func @transform_4(%arg0: i32) -> (i32, i32) {
    %c0_i32 = arith.constant 0 : i32
    %c0_i32_0 = arith.constant 0 : i32
    return %arg0, %c0_i32 : i32, i32
  }
}

</mosaic_0001>

<bundles_post_ra>
// kernel: tpu_custom_call.1
= control target key start
LH: loop header
LB: loop body
LE: loop exit
PB: predicated region body
PF: predicated region fallthrough
CT: control target
= control target key end

     0   :  { %9 = vsyncpa [#allocation3], 0  ;;  %s1435_s0 = inlined_call_operand.hbm [shape: f32[16,256], index: 0, kind: input, shape index: {}]   ;;  %s1436_s1 = inlined_call_operand.hbm [shape: bf16[256,256], index: 1, kind: input, shape index: {}]   ;;  %s1437_s2 = inlined_call_operand.hbm [shape: bf16[256,256], index: 2, kind: input, shape index: {}]   ;;  %s1438_s3 = inlined_call_operand.vmem [shape: f32[1,256], index: 3, kind: input, shape index: {}]   ;;  %s1439_s4 = inlined_call_operand.hbm [shape: f32[16,256], index: 4, kind: output, shape index: {}]  }
   0x1   :  { %10 = vsyncpa [#allocation6], 0 }
   0x2   :  { %11 = vsyncpa [#allocation4], 0  ;;  %s1037_s15 = smov [#allocation5]  }
   0x3   :  { %s29_s16 = sshll.u32 %s1037_s15, 4  ;;  %s30_s16 = int_to_ptr.vmem [resolvable:$true] %s29_s16 }
   0x4   :  { %s959_s17 = scalar_lea.vmem %s30_s16, 4096  ;;  %p964_p1 = scmp.lt.s32.totalorder %s30_s16, %s30_s16 }
   0x5   :  { %p960_p0 = scmp.ne.s32.totalorder %s30_s16, %s959_s17  ;;  %p965_p2 = scmp.lt.s32.totalorder %s959_s17, %s959_s17 }
   0x7   :  { %p966_p3 = por %p965_p2, %p964_p1 }
   0x9   :  { %p967_p4 = pnand %p966_p3, %p960_p0 }
   0xb   :  { %970 = shalt.err (!%p967_p4)
}
   0xc   :  { %s1038_s18 = smov 128   ;;  %s1039_s19 = smov 8  }
   0xd   :  { %35 = dma.hbm_to_vmem [thread:$0]  %s1436_s1, 4096, %s30_s16, [#allocation6], %s1038_s18, %s1038_s18, %s1039_s19  }
   0xe   :  { %s1040_s22 = smov [#allocation2]  }
   0xf   :  { %s17_s23 = sshll.u32 %s1040_s22, 4  ;;  %s18_s23 = int_to_ptr.vmem [resolvable:$true] %s17_s23 }
  0x10   :  { %s979_s24 = scalar_lea.vmem %s18_s23, 512  ;;  %p984_p6 = scmp.lt.s32.totalorder %s18_s23, %s18_s23 }
  0x11   :  { %p980_p5 = scmp.ne.s32.totalorder %s18_s23, %s979_s24  ;;  %p985_p7 = scmp.lt.s32.totalorder %s979_s24, %s979_s24 }
  0x13   :  { %p986_p8 = por %p985_p7, %p984_p6 }
  0x15   :  { %p987_p9 = pnand %p986_p8, %p980_p5 }
  0x17   :  { %990 = shalt.err (!%p987_p9)
}
  0x18   :  { %s1041_s25 = smov 256   ;;  %s1042_s26 = smov 16  }
  0x19   :  { %23 = dma.hbm_to_vmem [thread:$0]  %s1435_s0, 512, %s18_s23, [#allocation3], %s1041_s25, %s1041_s25, %s1042_s26  }
  0x1a   :  { %s1043_s1 = smov [#allocation7]  }
  0x1b   :  { %s41_s29 = sshll.u32 %s1043_s1, 4  ;;  %s42_s29 = int_to_ptr.vmem [resolvable:$true] %s41_s29 }
  0x1c   :  { %s999_s30 = scalar_lea.vmem %s42_s29, 4096  ;;  %p1004_p11 = scmp.lt.s32.totalorder %s42_s29, %s42_s29 }
  0x1d   :  { %p1000_p10 = scmp.ne.s32.totalorder %s42_s29, %s999_s30  ;;  %p1005_p12 = scmp.lt.s32.totalorder %s999_s30, %s999_s30 }
  0x1f   :  { %p1006_p13 = por %p1005_p12, %p1004_p11 }
  0x21   :  { %p1007_p0 = pnand %p1006_p13, %p1000_p10 }
  0x23   :  { %1010 = shalt.err (!%p1007_p0)
}
  0x24   :  { %47 = dma.hbm_to_vmem [thread:$0]  %s1437_s2, 4096, %s42_s29, [#allocation6], %s1038_s18, %s1038_s18, %s1039_s19  }
  0x25   :  { %1031 = dma.done.wait [#allocation3], 512  }
  0x26   :  { %1032 = vsyncadd [#allocation3], 4294966784 }
  0x27   :  { %1033 = dma.done.wait [#allocation6], 8192  }
  0x28   :  { %1034 = vsyncadd [#allocation6], 4294959104  ;;  %v1082_v0 = vld [vmem:[#allocation5 + $0x74] ss:$8 sps:$4 sm:$0xff]   ;;  %v1084_v1 = vld [vmem:[#allocation5 + $0x70] ss:$8 sps:$4 sm:$0xff]  }
  0x29   :  { %300 = vmatprep.subr.bf16.mxu0 %v1082_v0  ;;  %343 = vmatprep.subr.bf16.mxu1 %v1082_v0  ;;  %v1088_v2 = vld [vmem:[#allocation5 + $0x64] ss:$8 sps:$4 sm:$0xff]   ;;  %v1092_v3 = vld [vmem:[#allocation5 + $0x60] ss:$8 sps:$4 sm:$0xff]   ;;  %v1096_v4 = vld [vmem:[#allocation5 + $0x54] ss:$8 sps:$4 sm:$0xff]  }
  0x2a   :  { %301 = vmatpush1.bf16.msra.mxu0 %v1084_v1  ;;  %344 = vmatpush1.bf16.msra.mxu1 %v1084_v1  ;;  %v1100_v5 = vld [vmem:[#allocation5 + $0x50] ss:$8 sps:$4 sm:$0xff]   ;;  %v1104_v6 = vld [vmem:[#allocation5 + $0x44] ss:$8 sps:$4 sm:$0xff]   ;;  %v1108_v7 = vld [vmem:[#allocation5 + $0x40] ss:$8 sps:$4 sm:$0xff]  }
  0x2b   :  { %302 = vmatprep.subr.bf16.mxu0 %v1088_v2  ;;  %345 = vmatprep.subr.bf16.mxu1 %v1088_v2  ;;  %v1112_v8 = vld [vmem:[#allocation5 + $0x34] ss:$8 sps:$4 sm:$0xff]   ;;  %v1116_v9 = vld [vmem:[#allocation5 + $0x30] ss:$8 sps:$4 sm:$0xff]   ;;  %v1120_v10 = vld [vmem:[#allocation5 + $0x24] ss:$8 sps:$4 sm:$0xff]  }
  0x2c   :  { %v1124_v11 = vld [vmem:[#allocation5 + $0x20] ss:$8 sps:$4 sm:$0xff]   ;;  %v1128_v12 = vld [vmem:[#allocation5 + $0x14] ss:$8 sps:$4 sm:$0xff]   ;;  %v1134_v16 = vld [vmem:[#allocation5 + $0x10] ss:$8 sps:$4 sm:$0xff]  }
  0x2d   :  { %v125_v13 = vld [vmem:[#allocation2 + $0x8] sm:$0xff]  ;;  %v127_v14 = vld [vmem:[#allocation2 + $0x18] sm:$0xff]  ;;  %v124_v34 = vld [vmem:[#allocation2] sm:$0xff] }
  0x2e   :  { %303 = vmatpush1.bf16.msra.mxu0 %v1092_v3  ;;  %346 = vmatpush1.bf16.msra.mxu1 %v1092_v3  ;;  %v1130_v15 = vpack.c.bf16 %v127_v14, %v125_v13  ;;  %v1138_v17 = vld [vmem:[#allocation5 + $0x4] ss:$8 sps:$4 sm:$0xff]   ;;  %v1145_v22 = vld [vmem:[#allocation5] ss:$8 sps:$4 sm:$0xff]   ;;  %v1149_v23 = vld [vmem:[#allocation5 + $0xf4] ss:$8 sps:$4 sm:$0xff]  }
  0x2f   :  { %304 = vmatprep.subr.bf16.mxu0 %v1096_v4  ;;  %347 = vmatprep.subr.bf16.mxu1 %v1096_v4  ;;  %v1153_v25 = vld [vmem:[#allocation5 + $0xf0] ss:$8 sps:$4 sm:$0xff]   ;;  %v1157_v26 = vld [vmem:[#allocation5 + $0xe4] ss:$8 sps:$4 sm:$0xff]   ;;  %v1161_v27 = vld [vmem:[#allocation5 + $0xe0] ss:$8 sps:$4 sm:$0xff]  }
  0x30   :  { %v131_v18 = vunpack.c.l.bf16 %v1130_v15  ;;  %v133_v19 = vunpack.c.h.bf16 %v1130_v15  ;;  %375 = vmatprep.mubr.bf16.mxu1 %v1130_v15  ;;  %v1165_v28 = vld [vmem:[#allocation5 + $0xd4] ss:$8 sps:$4 sm:$0xff]   ;;  %v1169_v29 = vld [vmem:[#allocation5 + $0xd0] ss:$8 sps:$4 sm:$0xff]   ;;  %v1173_v30 = vld [vmem:[#allocation5 + $0xc4] ss:$8 sps:$4 sm:$0xff]  }
  0x31   :  { %v1177_v31 = vld [vmem:[#allocation5 + $0xc0] ss:$8 sps:$4 sm:$0xff]   ;;  %v1181_v32 = vld [vmem:[#allocation5 + $0xb4] ss:$8 sps:$4 sm:$0xff]   ;;  %v1185_v33 = vld [vmem:[#allocation5 + $0xb0] ss:$8 sps:$4 sm:$0xff]  }
  0x32   :  { %305 = vmatpush1.bf16.msra.mxu0 %v1100_v5  ;;  %348 = vmatpush1.bf16.msra.mxu1 %v1100_v5  ;;  %v135_v20 = vsub.f32 %v125_v13, %v131_v18  ;;  %v137_v21 = vsub.f32 %v127_v14, %v133_v19  ;;  %v126_v35 = vld [vmem:[#allocation2 + $0x10] sm:$0xff]  ;;  %v1189_v36 = vld [vmem:[#allocation5 + $0xa4] ss:$8 sps:$4 sm:$0xff]   ;;  %v1195_v38 = vld [vmem:[#allocation5 + $0xa0] ss:$8 sps:$4 sm:$0xff]  }
  0x33   :  { %306 = vmatprep.subr.bf16.mxu0 %v1104_v6  ;;  %349 = vmatprep.subr.bf16.mxu1 %v1104_v6  ;;  %v1191_v37 = vpack.c.bf16 %v126_v35, %v124_v34  ;;  %v1199_v39 = vld [vmem:[#allocation5 + $0x94] ss:$8 sps:$4 sm:$0xff]   ;;  %v1205_v42 = vld [vmem:[#allocation5 + $0x90] ss:$8 sps:$4 sm:$0xff]   ;;  %v1209_v43 = vld [vmem:[#allocation5 + $0x84] ss:$8 sps:$4 sm:$0xff]  }
  0x34   :  { %v139_v24 = vpack.c.bf16 %v137_v21, %v135_v20  ;;  %v1213_v46 = vld [vmem:[#allocation5 + $0x80] ss:$8 sps:$4 sm:$0xff]   ;;  %v1217_v47 = vld [vmem:[#allocation7 + $0x74] ss:$8 sps:$4 sm:$0xff]   ;;  %v1221_v49 = vld [vmem:[#allocation7 + $0x70] ss:$8 sps:$4 sm:$0xff]  }
  0x35   :  { %v130_v40 = vunpack.c.l.bf16 %v1191_v37  ;;  %v132_v41 = vunpack.c.h.bf16 %v1191_v37  ;;  %v1224_v50 = vld [vmem:[#allocation7 + $0x64] ss:$8 sps:$4 sm:$0xff]   ;;  %v1229_v51 = vld [vmem:[#allocation7 + $0x60] ss:$8 sps:$4 sm:$0xff]   ;;  %v1233_v52 = vld [vmem:[#allocation7 + $0x54] ss:$8 sps:$4 sm:$0xff]  }
  0x36   :  { %307 = vmatpush1.bf16.msra.mxu0 %v1108_v7  ;;  %350 = vmatpush1.bf16.msra.mxu1 %v1108_v7  ;;  %v1238_v53 = vld [vmem:[#allocation7 + $0x50] ss:$8 sps:$4 sm:$0xff]   ;;  %v1241_v54 = vld [vmem:[#allocation7 + $0x44] ss:$8 sps:$4 sm:$0xff]   ;;  %v1246_v55 = vld [vmem:[#allocation7 + $0x40] ss:$8 sps:$4 sm:$0xff]  }
  0x37   :  { %308 = vmatprep.subr.bf16.mxu0 %v1112_v8  ;;  %351 = vmatprep.subr.bf16.mxu1 %v1112_v8  ;;  %v134_v44 = vsub.f32 %v124_v34, %v130_v40  ;;  %v136_v45 = vsub.f32 %v126_v35, %v132_v41  ;;  %v1249_v56 = vld [vmem:[#allocation7 + $0x34] ss:$8 sps:$4 sm:$0xff]   ;;  %v1254_v57 = vld [vmem:[#allocation7 + $0x30] ss:$8 sps:$4 sm:$0xff]   ;;  %v1257_v58 = vld [vmem:[#allocation7 + $0x24] ss:$8 sps:$4 sm:$0xff]  }
  0x38   :  { %332 = vmatprep.mubr.bf16.mxu0 %v139_v24  ;;  %v1262_v59 = vld [vmem:[#allocation7 + $0x20] ss:$8 sps:$4 sm:$0xff]   ;;  %v1265_v60 = vld [vmem:[#allocation7 + $0x14] ss:$8 sps:$4 sm:$0xff]   ;;  %v1270_v61 = vld [vmem:[#allocation7 + $0x10] ss:$8 sps:$4 sm:$0xff]  }
  0x39   :  { %v138_v48 = vpack.c.bf16 %v136_v45, %v134_v44  ;;  %v1273_v62 = vld [vmem:[#allocation7 + $0x4] ss:$8 sps:$4 sm:$0xff]   ;;  %v1278_v63 = vld [vmem:[#allocation7] ss:$8 sps:$4 sm:$0xff]   ;;  %v1281_v13 = vld [vmem:[#allocation7 + $0xf4] ss:$8 sps:$4 sm:$0xff]  }
  0x3a   :  { %309 = vmatpush1.bf16.msra.mxu0 %v1116_v9  ;;  %352 = vmatpush1.bf16.msra.mxu1 %v1116_v9  ;;  %v1286_v14 = vld [vmem:[#allocation7 + $0xf0] ss:$8 sps:$4 sm:$0xff]   ;;  %v1294_v18 = vld [vmem:[#allocation7 + $0xe0] ss:$8 sps:$4 sm:$0xff]   ;;  %v1297_v19 = vld [vmem:[#allocation7 + $0xd4] ss:$8 sps:$4 sm:$0xff]  }
  0x3b   :  { %310 = vmatprep.subr.bf16.mxu0 %v1120_v10  ;;  %353 = vmatprep.subr.bf16.mxu1 %v1120_v10  ;;  %v1302_v20 = vld [vmem:[#allocation7 + $0xd0] ss:$8 sps:$4 sm:$0xff]   ;;  %v1305_v21 = vld [vmem:[#allocation7 + $0xc4] ss:$8 sps:$4 sm:$0xff]   ;;  %v1310_v24 = vld [vmem:[#allocation7 + $0xc0] ss:$8 sps:$4 sm:$0xff]  }
  0x3c   :  { %v1313_v34 = vld [vmem:[#allocation7 + $0xb4] ss:$8 sps:$4 sm:$0xff]   ;;  %v1318_v35 = vld [vmem:[#allocation7 + $0xb0] ss:$8 sps:$4 sm:$0xff]   ;;  %v1321_v40 = vld [vmem:[#allocation7 + $0xa4] ss:$8 sps:$4 sm:$0xff]  }
  0x3d   :  { %1441 = vst [vmem:[#allocation12_spill] sm:$0xff] %v1321_v40  ;;  %v1326_v41 = vld [vmem:[#allocation7 + $0xa0] ss:$8 sps:$4 sm:$0xff]   ;;  %v1329_v44 = vld [vmem:[#allocation7 + $0x94] ss:$8 sps:$4 sm:$0xff]  }
  0x3e   :  { %311 = vmatpush1.bf16.msra.mxu0 %v1124_v11  ;;  %354 = vmatpush1.bf16.msra.mxu1 %v1124_v11  ;;  %v1334_v45 = vld [vmem:[#allocation7 + $0x90] ss:$8 sps:$4 sm:$0xff]  }
  0x3f   :  { %312 = vmatprep.subr.bf16.mxu0 %v1128_v12  ;;  %355 = vmatprep.subr.bf16.mxu1 %v1128_v12 }
  0x42   :  { %313 = vmatpush1.bf16.msra.mxu0 %v1134_v16  ;;  %356 = vmatpush1.bf16.msra.mxu1 %v1134_v16 }
  0x43   :  { %314 = vmatprep.subr.bf16.mxu0 %v1138_v17  ;;  %357 = vmatprep.subr.bf16.mxu1 %v1138_v17 }
  0x46   :  { %315 = vmatpush1.bf16.msra.mxu0 %v1145_v22  ;;  %358 = vmatpush1.bf16.msra.mxu1 %v1145_v22 }
  0x47   :  { %316 = vmatprep.subr.bf16.mxu0 %v1149_v23  ;;  %359 = vmatprep.subr.bf16.mxu1 %v1149_v23 }
  0x4a   :  { %317 = vmatpush2.bf16.msra.mxu0 %v1153_v25  ;;  %360 = vmatpush2.bf16.msra.mxu1 %v1153_v25 }
  0x4b   :  { %318 = vmatprep.subr.bf16.mxu0 %v1157_v26  ;;  %361 = vmatprep.subr.bf16.mxu1 %v1157_v26 }
  0x4e   :  { %319 = vmatpush2.bf16.msra.mxu0 %v1161_v27  ;;  %362 = vmatpush2.bf16.msra.mxu1 %v1161_v27 }
  0x4f   :  { %320 = vmatprep.subr.bf16.mxu0 %v1165_v28  ;;  %363 = vmatprep.subr.bf16.mxu1 %v1165_v28 }
  0x52   :  { %321 = vmatpush2.bf16.msra.mxu0 %v1169_v29  ;;  %364 = vmatpush2.bf16.msra.mxu1 %v1169_v29 }
  0x53   :  { %322 = vmatprep.subr.bf16.mxu0 %v1173_v30  ;;  %365 = vmatprep.subr.bf16.mxu1 %v1173_v30 }
  0x56   :  { %323 = vmatpush2.bf16.msra.mxu0 %v1177_v31  ;;  %366 = vmatpush2.bf16.msra.mxu1 %v1177_v31 }
  0x57   :  { %324 = vmatprep.subr.bf16.mxu0 %v1181_v32  ;;  %367 = vmatprep.subr.bf16.mxu1 %v1181_v32 }
  0x5a   :  { %325 = vmatpush2.bf16.msra.mxu0 %v1185_v33  ;;  %368 = vmatpush2.bf16.msra.mxu1 %v1185_v33 }
  0x5b   :  { %326 = vmatprep.subr.bf16.mxu0 %v1189_v36  ;;  %369 = vmatprep.subr.bf16.mxu1 %v1189_v36 }
  0x5e   :  { %327 = vmatpush2.bf16.msra.mxu0 %v1195_v38  ;;  %370 = vmatpush2.bf16.msra.mxu1 %v1195_v38 }
  0x5f   :  { %328 = vmatprep.subr.bf16.mxu0 %v1199_v39  ;;  %371 = vmatprep.subr.bf16.mxu1 %v1199_v39 }
  0x62   :  { %329 = vmatpush2.bf16.msra.mxu0 %v1205_v42  ;;  %372 = vmatpush2.bf16.msra.mxu1 %v1205_v42 }
  0x63   :  { %330 = vmatprep.subr.bf16.mxu0 %v1209_v43  ;;  %373 = vmatprep.subr.bf16.mxu1 %v1209_v43 }
  0x66   :  { %331 = vmatpush2.bf16.msra.mxu0 %v1213_v46  ;;  %374 = vmatpush2.bf16.msra.mxu1 %v1213_v46 }
  0x67   :  { %546 = vmatprep.subr.bf16.mxu0 %v1217_v47  ;;  %624 = vmatprep.subr.bf16.mxu1 %v1082_v0 }
  0x69   :  { %333 = vmatmul.mubr.bf16.vlgmr.msra.gmra.mxu0 %v138_v48  ;;  %376 = vmatmul.mubr.bf16.vlgmr.msra.gmra.mxu1 %v1191_v37  ;;  %v1337_v48 = vld [vmem:[#allocation7 + $0x84] ss:$8 sps:$4 sm:$0xff]  }
  0x6a   :  { %547 = vmatpush1.bf16.msra.mxu0 %v1221_v49  ;;  %578 = vmatprep.mubr.bf16.mxu0 %v1130_v15  ;;  %v1289_v15 = vld [vmem:[#allocation7 + $0xe4] ss:$8 sps:$4 sm:$0xff]  }
  0x6b   :  { %548 = vmatprep.subr.bf16.mxu0 %v1224_v50  ;;  %625 = vmatpush1.bf16.msra.mxu1 %v1084_v1 }
  0x6c   :  { %626 = vmatprep.subr.bf16.mxu1 %v1088_v2 }
  0x6e   :  { %549 = vmatpush1.bf16.msra.mxu0 %v1229_v51 }
  0x6f   :  { %550 = vmatprep.subr.bf16.mxu0 %v1233_v52  ;;  %627 = vmatpush1.bf16.msra.mxu1 %v1092_v3 }
  0x70   :  { %628 = vmatprep.subr.bf16.mxu1 %v1096_v4 }
  0x72   :  { %551 = vmatpush1.bf16.msra.mxu0 %v1238_v53 }
  0x73   :  { %552 = vmatprep.subr.bf16.mxu0 %v1241_v54  ;;  %629 = vmatpush1.bf16.msra.mxu1 %v1100_v5 }
  0x74   :  { %630 = vmatprep.subr.bf16.mxu1 %v1104_v6 }
  0x76   :  { %553 = vmatpush1.bf16.msra.mxu0 %v1246_v55 }
  0x77   :  { %554 = vmatprep.subr.bf16.mxu0 %v1249_v56  ;;  %631 = vmatpush1.bf16.msra.mxu1 %v1108_v7 }
  0x78   :  { %632 = vmatprep.subr.bf16.mxu1 %v1112_v8 }
  0x7a   :  { %555 = vmatpush1.bf16.msra.mxu0 %v1254_v57 }
  0x7b   :  { %556 = vmatprep.subr.bf16.mxu0 %v1257_v58  ;;  %633 = vmatpush1.bf16.msra.mxu1 %v1116_v9 }
  0x7c   :  { %634 = vmatprep.subr.bf16.mxu1 %v1120_v10 }
  0x7e   :  { %557 = vmatpush1.bf16.msra.mxu0 %v1262_v59 }
  0x7f   :  { %558 = vmatprep.subr.bf16.mxu0 %v1265_v60  ;;  %635 = vmatpush1.bf16.msra.mxu1 %v1124_v11 }
  0x80   :  { %636 = vmatprep.subr.bf16.mxu1 %v1128_v12 }
  0x82   :  { %559 = vmatpush1.bf16.msra.mxu0 %v1270_v61 }
  0x83   :  { %560 = vmatprep.subr.bf16.mxu0 %v1273_v62  ;;  %637 = vmatpush1.bf16.msra.mxu1 %v1134_v16 }
  0x84   :  { %638 = vmatprep.subr.bf16.mxu1 %v1138_v17 }
  0x86   :  { %561 = vmatpush1.bf16.msra.mxu0 %v1278_v63 }
  0x87   :  { %562 = vmatprep.subr.bf16.mxu0 %v1281_v13  ;;  %639 = vmatpush1.bf16.msra.mxu1 %v1145_v22 }
  0x88   :  { %640 = vmatprep.subr.bf16.mxu1 %v1149_v23 }
  0x8a   :  { %563 = vmatpush2.bf16.msra.mxu0 %v1286_v14 }
  0x8b   :  { %564 = vmatprep.subr.bf16.mxu0 %v1289_v15  ;;  %641 = vmatpush2.bf16.msra.mxu1 %v1153_v25 }
  0x8c   :  { %642 = vmatprep.subr.bf16.mxu1 %v1157_v26 }
  0x8e   :  { %565 = vmatpush2.bf16.msra.mxu0 %v1294_v18 }
  0x8f   :  { %566 = vmatprep.subr.bf16.mxu0 %v1297_v19  ;;  %643 = vmatpush2.bf16.msra.mxu1 %v1161_v27 }
  0x90   :  { %644 = vmatprep.subr.bf16.mxu1 %v1165_v28 }
  0x92   :  { %567 = vmatpush2.bf16.msra.mxu0 %v1302_v20 }
  0x93   :  { %568 = vmatprep.subr.bf16.mxu0 %v1305_v21  ;;  %645 = vmatpush2.bf16.msra.mxu1 %v1169_v29 }
  0x94   :  { %646 = vmatprep.subr.bf16.mxu1 %v1173_v30 }
  0x96   :  { %569 = vmatpush2.bf16.msra.mxu0 %v1310_v24 }
  0x97   :  { %570 = vmatprep.subr.bf16.mxu0 %v1313_v34  ;;  %647 = vmatpush2.bf16.msra.mxu1 %v1177_v31 }
  0x98   :  { %648 = vmatprep.subr.bf16.mxu1 %v1181_v32 }
  0x9a   :  { %571 = vmatpush2.bf16.msra.mxu0 %v1318_v35 }
  0x9b   :  { %572 = vmatprep.subr.bf16.mxu0 %v1321_v40  ;;  %649 = vmatpush2.bf16.msra.mxu1 %v1185_v33  ;;  %v1342_v40 = vld [vmem:[#allocation7 + $0x80] ss:$8 sps:$4 sm:$0xff]  }
  0x9c   :  { %650 = vmatprep.subr.bf16.mxu1 %v1189_v36 }
  0x9e   :  { %573 = vmatpush2.bf16.msra.mxu0 %v1326_v41 }
  0x9f   :  { %574 = vmatprep.subr.bf16.mxu0 %v1329_v44  ;;  %651 = vmatpush2.bf16.msra.mxu1 %v1195_v38 }
  0xa0   :  { %652 = vmatprep.subr.bf16.mxu1 %v1199_v39 }
  0xa2   :  { %575 = vmatpush2.bf16.msra.mxu0 %v1334_v45 }
  0xa3   :  { %576 = vmatprep.subr.bf16.mxu0 %v1337_v48  ;;  %653 = vmatpush2.bf16.msra.mxu1 %v1205_v42 }
  0xa4   :  { %654 = vmatprep.subr.bf16.mxu1 %v1209_v43 }
  0xa6   :  { %577 = vmatpush2.bf16.msra.mxu0 %v1342_v40 }
  0xa7   :  { %667 = vmatprep.subr.bf16.mxu0 %v1082_v0  ;;  %655 = vmatpush2.bf16.msra.mxu1 %v1213_v46 }
  0xa8   :  { %710 = vmatprep.subr.bf16.mxu1 %v1217_v47 }
  0xa9   :  { %579 = vmatmul.mubr.bf16.vlgmr.msra.gmra.mxu0 %v1191_v37 }
  0xaa   :  { %668 = vmatpush1.bf16.msra.mxu0 %v1084_v1  ;;  %v594_v1 = vlaneseq }
  0xab   :  { %669 = vmatprep.subr.bf16.mxu0 %v1088_v2 }
  0xae   :  { %670 = vmatpush1.bf16.msra.mxu0 %v1092_v3 }
  0xaf   :  { %671 = vmatprep.subr.bf16.mxu0 %v1096_v4  ;;  %v595_v4 = vshrl.u32 %v594_v1, 7 }
  0xb2   :  { %672 = vmatpush1.bf16.msra.mxu0 %v1100_v5 }
  0xb3   :  { %673 = vmatprep.subr.bf16.mxu0 %v1104_v6 }
  0xb6   :  { %674 = vmatpush1.bf16.msra.mxu0 %v1108_v7  ;;  %v596_v7 = vsub.s32 0, %v595_v4 }
  0xb7   :  { %675 = vmatprep.subr.bf16.mxu0 %v1112_v8 }
  0xba   :  { %676 = vmatpush1.bf16.msra.mxu0 %v1116_v9 }
  0xbb   :  { %677 = vmatprep.subr.bf16.mxu0 %v1120_v10  ;;  %v123_v10 = vld [vmem:[%s1438_s3] sm:$0x3]  ;;  %s1044_s3 = smov [#allocation8]  }
  0xbc   :  { %s770_s7 = sshll.u32 %s1044_s3, 4  ;;  %s771_s7 = int_to_ptr.vmem [resolvable:$true] %s770_s7 }
  0xbd   :  { %s1011_s8 = scalar_lea.vmem %s771_s7, 512  ;;  %p1016_p2 = scmp.lt.s32.totalorder %s771_s7, %s771_s7 }
  0xbe   :  { %678 = vmatpush1.bf16.msra.mxu0 %v1124_v11  ;;  %p1012_p1 = scmp.ne.s32.totalorder %s771_s7, %s1011_s8  ;;  %p1017_p3 = scmp.lt.s32.totalorder %s1011_s8, %s1011_s8 }
  0xbf   :  { %679 = vmatprep.subr.bf16.mxu0 %v1128_v12  ;;  %v600_v12 = vsub.s32 1, %v595_v4 }
  0xc0   :  { %p1018_p4 = por %p1017_p3, %p1016_p2 }
  0xc2   :  { %680 = vmatpush1.bf16.msra.mxu0 %v1134_v16  ;;  %p1019_p5 = pnand %p1018_p4, %p1012_p1 }
  0xc3   :  { %681 = vmatprep.subr.bf16.mxu0 %v1138_v17 }
  0xc6   :  { %682 = vmatpush1.bf16.msra.mxu0 %v1145_v22 }
  0xc7   :  { %683 = vmatprep.subr.bf16.mxu0 %v1149_v23  ;;  %v1386_v23 = vrot.slane %v123_v10, %v596_v7 }
  0xca   :  { %684 = vmatpush2.bf16.msra.mxu0 %v1153_v25 }
  0xcb   :  { %685 = vmatprep.subr.bf16.mxu0 %v1157_v26 }
  0xce   :  { %686 = vmatpush2.bf16.msra.mxu0 %v1161_v27 }
  0xcf   :  { %687 = vmatprep.subr.bf16.mxu0 %v1165_v28 }
  0xd2   :  { %688 = vmatpush2.bf16.msra.mxu0 %v1169_v29  ;;  %v1388_v29 = vrot.slane %v123_v10, %v600_v12 }
  0xd3   :  { %689 = vmatprep.subr.bf16.mxu0 %v1173_v30 }
  0xd6   :  { %690 = vmatpush2.bf16.msra.mxu0 %v1177_v31 }
  0xd7   :  { %691 = vmatprep.subr.bf16.mxu0 %v1181_v32 }
  0xda   :  { %692 = vmatpush2.bf16.msra.mxu0 %v1185_v33 }
  0xdb   :  { %693 = vmatprep.subr.bf16.mxu0 %v1189_v36 }
  0xde   :  { %694 = vmatpush2.bf16.msra.mxu0 %v1195_v38 }
  0xdf   :  { %695 = vmatprep.subr.bf16.mxu0 %v1199_v39 }
  0xe2   :  { %696 = vmatpush2.bf16.msra.mxu0 %v1205_v42 }
  0xe3   :  { %697 = vmatprep.subr.bf16.mxu0 %v1209_v43 }
  0xe6   :  { %698 = vmatpush2.bf16.msra.mxu0 %v1213_v46 }
 0x129   :  { %v334_v0 = vpop.f32.mrf.mxu0  ;;  %v377_v2 = vpop.f32.mrf.mxu1 }
 0x12a   :  { %v378_v11 = vadd.f32 %v377_v2, %v334_v0 }
 0x12b   :  { %v336_v3 = vpop.f32.mrf.mxu0  ;;  %v379_v5 = vpop.f32.mrf.mxu1 }
 0x12c   :  { %v380_v17 = vadd.f32 %v379_v5, %v336_v3 }
 0x12d   :  { %v338_v6 = vpop.f32.mrf.mxu0  ;;  %v381_v8 = vpop.f32.mrf.mxu1 }
 0x12e   :  { %v382_v27 = vadd.f32 %v381_v8, %v338_v6 }
 0x12f   :  { %v340_v9 = vpop.f32.mrf.mxu0  ;;  %v383_v25 = vpop.f32.mrf.mxu1 }
 0x130   :  { %v384_v31 = vadd.f32 %v383_v25, %v340_v9 }
 0x169   :  { %v580_v16 = vpop.f32.mrf.mxu0 }
 0x16a   :  { %v589_v22 = vadd.f32 %v580_v16, %v378_v11 }
 0x16b   :  { %v582_v26 = vpop.f32.mrf.mxu0 }
 0x16c   :  { %v590_v28 = vadd.f32 %v582_v26, %v380_v17  ;;  %v604_v32 = vadd.f32 %v1386_v23, %v589_v22 }
 0x16d   :  { %v584_v30 = vpop.f32.mrf.mxu0 }
 0x16e   :  { %v591_v33 = vadd.f32 %v584_v30, %v382_v27  ;;  %v605_v37 = vadd.f32 %v1388_v29, %v590_v28  ;;  %v608_v42 = vmax.f32 %v604_v32, 0.0 }
 0x16f   :  { %v586_v36 = vpop.f32.mrf.mxu0 }
 0x170   :  { %v606_v38 = vadd.f32 %v1386_v23, %v591_v33  ;;  %v592_v39 = vadd.f32 %v586_v36, %v384_v31  ;;  %v609_v47 = vmax.f32 %v605_v37, 0.0 }
 0x172   :  { %v610_v43 = vmax.f32 %v606_v38, 0.0  ;;  %v607_v46 = vadd.f32 %v1388_v29, %v592_v39 }
 0x174   :  { %v612_v0 = vpack.c.bf16 %v610_v43, %v608_v42  ;;  %v611_v1 = vmax.f32 %v607_v46, 0.0 }
 0x176   :  { %v614_v2 = vunpack.c.l.bf16 %v612_v0  ;;  %v616_v3 = vunpack.c.h.bf16 %v612_v0  ;;  %v613_v4 = vpack.c.bf16 %v611_v1, %v609_v47 }
 0x178   :  { %v617_v5 = vunpack.c.h.bf16 %v613_v4  ;;  %699 = vmatprep.mubr.bf16.mxu0 %v613_v4  ;;  %v615_v6 = vunpack.c.l.bf16 %v613_v4  ;;  %v618_v7 = vsub.f32 %v608_v42, %v614_v2  ;;  %v620_v8 = vsub.f32 %v610_v43, %v616_v3 }
 0x179   :  { %700 = vmatmul.mubr.bf16.vlgmr.msra.gmra.mxu0 %v612_v0 }
 0x17a   :  { %v621_v9 = vsub.f32 %v611_v1, %v617_v5  ;;  %v619_v10 = vsub.f32 %v609_v47, %v615_v6  ;;  %v622_v12 = vpack.c.bf16 %v620_v8, %v618_v7 }
 0x17c   :  { %v623_v11 = vpack.c.bf16 %v621_v9, %v619_v10 }
 0x17e   :  { %656 = vmatprep.mubr.bf16.mxu1 %v623_v11 }
 0x17f   :  { %657 = vmatmul.mubr.bf16.vlgmr.msra.gmra.mxu1 %v622_v12 }
 0x180   :  { %711 = vmatpush1.bf16.msra.mxu1 %v1221_v49  ;;  %742 = vmatprep.mubr.bf16.mxu1 %v613_v4  ;;  %v1442_v49 = vld [vmem:[#allocation12_spill] sm:$0xff] }
 0x181   :  { %712 = vmatprep.subr.bf16.mxu1 %v1224_v50 }
 0x184   :  { %713 = vmatpush1.bf16.msra.mxu1 %v1229_v51 }
 0x185   :  { %714 = vmatprep.subr.bf16.mxu1 %v1233_v52 }
 0x188   :  { %715 = vmatpush1.bf16.msra.mxu1 %v1238_v53 }
 0x189   :  { %716 = vmatprep.subr.bf16.mxu1 %v1241_v54 }
 0x18c   :  { %717 = vmatpush1.bf16.msra.mxu1 %v1246_v55 }
 0x18d   :  { %718 = vmatprep.subr.bf16.mxu1 %v1249_v56 }
 0x190   :  { %719 = vmatpush1.bf16.msra.mxu1 %v1254_v57 }
 0x191   :  { %720 = vmatprep.subr.bf16.mxu1 %v1257_v58 }
 0x194   :  { %721 = vmatpush1.bf16.msra.mxu1 %v1262_v59 }
 0x195   :  { %722 = vmatprep.subr.bf16.mxu1 %v1265_v60 }
 0x198   :  { %723 = vmatpush1.bf16.msra.mxu1 %v1270_v61 }
 0x199   :  { %724 = vmatprep.subr.bf16.mxu1 %v1273_v62 }
 0x19c   :  { %725 = vmatpush1.bf16.msra.mxu1 %v1278_v63 }
 0x19d   :  { %726 = vmatprep.subr.bf16.mxu1 %v1281_v13 }
 0x1a0   :  { %727 = vmatpush2.bf16.msra.mxu1 %v1286_v14 }
 0x1a1   :  { %728 = vmatprep.subr.bf16.mxu1 %v1289_v15 }
 0x1a4   :  { %729 = vmatpush2.bf16.msra.mxu1 %v1294_v18 }
 0x1a5   :  { %730 = vmatprep.subr.bf16.mxu1 %v1297_v19 }
 0x1a8   :  { %731 = vmatpush2.bf16.msra.mxu1 %v1302_v20 }
 0x1a9   :  { %732 = vmatprep.subr.bf16.mxu1 %v1305_v21 }
 0x1ac   :  { %733 = vmatpush2.bf16.msra.mxu1 %v1310_v24 }
 0x1ad   :  { %734 = vmatprep.subr.bf16.mxu1 %v1313_v34 }
 0x1b0   :  { %735 = vmatpush2.bf16.msra.mxu1 %v1318_v35 }
 0x1b1   :  { %736 = vmatprep.subr.bf16.mxu1 %v1442_v49 }
 0x1b4   :  { %737 = vmatpush2.bf16.msra.mxu1 %v1326_v41 }
 0x1b5   :  { %738 = vmatprep.subr.bf16.mxu1 %v1329_v44 }
 0x1b8   :  { %739 = vmatpush2.bf16.msra.mxu1 %v1334_v45 }
 0x1b9   :  { %740 = vmatprep.subr.bf16.mxu1 %v1337_v48 }
 0x1bc   :  { %741 = vmatpush2.bf16.msra.mxu1 %v1342_v40 }
 0x1bf   :  { %743 = vmatmul.mubr.bf16.vlgmr.msra.gmra.mxu1 %v612_v0 }
 0x239   :  { %v701_v52 = vpop.f32.mrf.mxu0 }
 0x23b   :  { %v703_v54 = vpop.f32.mrf.mxu0 }
 0x23d   :  { %v705_v57 = vpop.f32.mrf.mxu0 }
 0x23f   :  { %v658_v50 = vpop.f32.mrf.mxu1  ;;  %v707_v14 = vpop.f32.mrf.mxu0 }
 0x240   :  { %v702_v56 = vadd.f32 %v701_v52, %v658_v50 }
 0x241   :  { %v660_v51 = vpop.f32.mrf.mxu1 }
 0x242   :  { %v704_v59 = vadd.f32 %v703_v54, %v660_v51 }
 0x243   :  { %v662_v53 = vpop.f32.mrf.mxu1 }
 0x244   :  { %v706_v62 = vadd.f32 %v705_v57, %v662_v53 }
 0x245   :  { %v664_v55 = vpop.f32.mrf.mxu1 }
 0x246   :  { %v708_v18 = vadd.f32 %v707_v14, %v664_v55 }
 0x27f   :  { %v744_v58 = vpop.f32.mrf.mxu1 }
 0x280   :  { %v753_v60 = vadd.f32 %v744_v58, %v702_v56 }
 0x281   :  { %v746_v61 = vpop.f32.mrf.mxu1 }
 0x282   :  { %v757_v63 = vadd.f32 %v753_v60, %v1386_v23  ;;  %v754_v13 = vadd.f32 %v746_v61, %v704_v59 }
 0x283   :  { %v748_v15 = vpop.f32.mrf.mxu1 }
 0x284   :  { %761 = vst [vmem:[#allocation8] sm:$0xff] %v757_v63  ;;  %v758_v19 = vadd.f32 %v754_v13, %v1388_v29  ;;  %v755_v20 = vadd.f32 %v748_v15, %v706_v62 }
 0x285   :  { %v750_v21 = vpop.f32.mrf.mxu1 }
 0x286   :  { %762 = vst [vmem:[#allocation8 + $0x8] sm:$0xff] %v758_v19  ;;  %v759_v24 = vadd.f32 %v755_v20, %v1386_v23  ;;  %v756_v34 = vadd.f32 %v750_v21, %v708_v18 }
 0x288   :  { %763 = vst [vmem:[#allocation8 + $0x10] sm:$0xff] %v759_v24  ;;  %v760_v35 = vadd.f32 %v756_v34, %v1388_v29 }
 0x28a   :  { %764 = vst [vmem:[#allocation8 + $0x18] sm:$0xff] %v760_v35 }
 0x28b   :  { %1022 = shalt.err (!%p1019_p5)
}
 0x28c   :  { %776 = dma.vmem_to_hbm [thread:$0]  %s771_s7, 512, %s1439_s4, [#allocation4], %s1041_s25, %s1041_s25, %s1042_s26  }
 0x28d   :  { %1035 = dma.done.wait [#allocation4], 512  }
 0x28e   :  { %1036 = vsyncadd [#allocation4], 4294966784 }
 0x28f   :  { %780 = vsyncpa [#allocation3], 1 }
 0x290   :  { %781 = vsyncpa [#allocation6], 1 }
 0x291   :  { %782 = vsyncpa [#allocation4], 1 }

</bundles_post_ra>
